<compile_context>
chip_gen: v7x
topology: tpu7x:2x2x1
jax: 0.10.0
libtpu: 0.0.40
codegen_flags: <defaults>
</compile_context>

<pallas_src>
import functools
import math

import jax
import jax.numpy as jnp
from jax.experimental import pallas as pl
from jax.experimental.pallas import tpu as pltpu


# ------------------------------ Pallas kernel -------------------------------

def _atom_embedding_kernel(ids_ref, coord_ref, tab_ref, wc_ref, bc_ref, o_ref,
                           *, chunk):
    tl = o_ref.shape[0]                # token rows in this block (static)
    vtot = tab_ref.shape[0]            # fused vocab size (Va + Vc)

    tab = tab_ref[...]                 # (Vtot, D)  tiny, grid-invariant, VMEM-resident
    w0 = wc_ref[0:1, :]                # (1, D) rows of the coord Linear weight
    w1 = wc_ref[1:2, :]
    w2 = wc_ref[2:3, :]
    bias = bc_ref[...]                 # (1, D)

    def process(off, size):
        ids = ids_ref[pl.ds(off, size), :]                       # (size, 2) int32
        iota = jax.lax.broadcasted_iota(jnp.int32, (size, vtot), 1)
        # Fused lookup: atom ids live in [0, Va), chiral ids were pre-offset by Va,
        # so one (size, Vtot) one-hot with two hot entries per row == both lookups
        # in a single MXU matmul (pad rows of the tables are zero -> padding_idx).
        oh = ((ids[:, 0:1] == iota).astype(jnp.float32)
              + (ids[:, 1:2] == iota).astype(jnp.float32))
        emb = jnp.dot(oh, tab, preferred_element_type=jnp.float32,
                      precision=jax.lax.Precision.HIGHEST)       # exact selection

        # Coordinate linear (K = 3): three exact-f32 VPU broadcast-FMAs + bias.
        coord = coord_ref[pl.ds(off, size), :]                   # (size, 3)
        coord_emb = (coord[:, 0:1] * w0 + coord[:, 1:2] * w1
                     + coord[:, 2:3] * w2 + bias)                # (size, D)

        o_ref[pl.ds(off, size), :] = (emb + coord_emb).astype(o_ref.dtype)

    # Chunk the block so the lane-sparse one-hot stays within the 64-vreg file
    # even for multi-MiB DMA blocks (big blocks for HBM roofline, small live set).
    n_chunks = tl // chunk
    rem = tl - n_chunks * chunk
    if n_chunks > 0:
        @pl.loop(0, n_chunks)
        def _(c):
            process(pl.multiple_of(c * chunk, chunk), chunk)
    if rem > 0:
        process(n_chunks * chunk, rem)


# --------------------------------- wrapper ----------------------------------

def _pick_token_tile(n_tokens, d, out_itemsize, target_bytes=2 * 1024 * 1024):
    """Output-block rows sized by bytes (~2 MiB), multiple of 128 sublanes."""
    rows = target_bytes // (out_itemsize * d)
    rows = max(128, (rows // 128) * 128)
    if n_tokens <= rows:
        # Small problem: if there's enough work, still split into ~2 blocks so both
        # v7x TensorCores get fed; otherwise one full block (kernel chunks inside).
        if n_tokens >= 256:
            half = -(-n_tokens // 2)
            return ((half + 7) // 8) * 8
        return n_tokens
    return rows


def _pick_chunk(d):
    """In-kernel row chunk: keep (chunk, D) ~ 16K elems (~16 vregs) per operand."""
    return max(8, min(512, ((16384 // d) // 8) * 8))


def atom_embedding(atom_types, chirals, coordinates, params, *,
                   out_dtype=jnp.float32, token_tile=None):
    """atom_types, chirals: int [B, L]; coordinates: float [B, 3] (docstring shape,
    PyTorch broadcast => requires L == B) or [B, L, 3] (per-atom coordinates)."""
    bsz, length = atom_types.shape
    atab = params["atom_emb"]                 # (Va, D), pad row zero
    ctab = params["chiral_emb"]               # (Vc, D), pad row zero
    wc = params["coord_w"]                    # (3, D)
    bc = params["coord_b"].reshape(1, -1)     # (1, D)
    va, d = atab.shape

    n = bsz * length                          # flattened token axis

    # One fused table and one packed id array -> one matmul + one small DMA / step.
    tab = jnp.concatenate([atab, ctab], axis=0)                       # (Va+Vc, D)
    ids = jnp.stack([atom_types.astype(jnp.int32),
                     chirals.astype(jnp.int32) + va], axis=-1).reshape(n, 2)

    if coordinates.ndim == 2:
        # Docstring shape [B, 3]: PyTorch broadcasting of [B,L,D] + [B,D] aligns the
        # coordinate embedding with the LENGTH axis and only works when L == B.
        if coordinates.shape != (bsz, 3) or length != bsz:
            raise ValueError(
                "coordinates [B,3] only broadcasts in the PyTorch forward when "
                f"length == batch; got {coordinates.shape} with (B,L)=({bsz},{length})")
        coords_tok = jnp.broadcast_to(coordinates[None, :, :],
                                      (bsz, length, 3)).reshape(n, 3)
    elif coordinates.ndim == 3:
        # TODO(synk): per-atom coordinates [B, L, 3] (probable intent, not the
        # docstring shape) -- recommended path.
        if coordinates.shape != (bsz, length, 3):
            raise ValueError(f"bad per-atom coordinates shape {coordinates.shape}")
        coords_tok = coordinates.reshape(n, 3)
    else:
        raise ValueError("coordinates must be [B, 3] or [B, L, 3]")
    coords_tok = coords_tok.astype(jnp.float32)

    tl = token_tile if token_tile is not None else _pick_token_tile(
        n, d, jnp.dtype(out_dtype).itemsize)
    chunk = _pick_chunk(d)
    grid = (pl.cdiv(n, tl),)                  # 1-D token grid; edge block is masked

    kernel = functools.partial(_atom_embedding_kernel, chunk=chunk)

    out = pl.pallas_call(
        kernel,
        grid=grid,
        in_specs=[
            pl.BlockSpec((tl, 2), lambda t: (t, 0)),      # packed ids
            pl.BlockSpec((tl, 3), lambda t: (t, 0)),      # per-token coordinates
            pl.BlockSpec(tab.shape, lambda t: (0, 0)),    # fused table (resident)
            pl.BlockSpec(wc.shape, lambda t: (0, 0)),     # coord weight (resident)
            pl.BlockSpec(bc.shape, lambda t: (0, 0)),     # coord bias   (resident)
        ],
        out_specs=pl.BlockSpec((tl, d), lambda t: (t, 0)),
        out_shape=jax.ShapeDtypeStruct((n, d), out_dtype),
        compiler_params=pltpu.CompilerParams(
            dimension_semantics=("parallel",),
            vmem_limit_bytes=32 * 1024 * 1024,            # safe on v7x's 64 MiB VMEM
        ),
    )(ids, coords_tok, tab, wc, bc)

    return out.reshape(bsz, length, d)


# ---------------------------------- setup -----------------------------------

def init_params(key, output_size, atom_voc, atom_pad, chiral_voc, chiral_pad):
    ka, kc, kw, kb = jax.random.split(key, 4)
    atom_emb = jax.random.normal(ka, (atom_voc, output_size), dtype=jnp.float32)
    atom_emb = atom_emb.at[atom_pad].set(0.0)        # padding_idx row is zero
    chiral_emb = jax.random.normal(kc, (chiral_voc, output_size), dtype=jnp.float32)
    chiral_emb = chiral_emb.at[chiral_pad].set(0.0)  # padding_idx row is zero
    bound = 1.0 / math.sqrt(3.0)                     # nn.Linear(3, D) init range
    coord_w = jax.random.uniform(kw, (3, output_size), jnp.float32, -bound, bound)
    coord_b = jax.random.uniform(kb, (output_size,), jnp.float32, -bound, bound)
    return {"atom_emb": atom_emb, "chiral_emb": chiral_emb,
            "coord_w": coord_w, "coord_b": coord_b}


def _coord_lin_ref(coords, params):
    # Same exact-f32 FMA order as the kernel (avoids reference-side matmul rounding).
    wc, bc = params["coord_w"], params["coord_b"]
    return (coords[..., 0:1] * wc[0:1, :] + coords[..., 1:2] * wc[1:2, :]
            + coords[..., 2:3] * wc[2:3, :] + bc)


if __name__ == "__main__":
    D = 128                                   # lane-dense output (multiple of 128)
    ATOM_VOC, ATOM_PAD = 16, 0
    CHIRAL_VOC, CHIRAL_PAD = 4, 0

    key = jax.random.PRNGKey(0)
    k_at, k_ch, k_co, k_p, k_co3 = jax.random.split(key, 5)
    params = init_params(k_p, D, ATOM_VOC, ATOM_PAD, CHIRAL_VOC, CHIRAL_PAD)

    # --- 1) Docstring shapes: coordinates [B, 3]; PyTorch broadcast needs L == B.
    B = L = 8
    atom_types = jax.random.randint(k_at, (B, L), 0, ATOM_VOC, dtype=jnp.int32)
    chirals = jax.random.randint(k_ch, (B, L), 0, CHIRAL_VOC, dtype=jnp.int32)
    coordinates = jax.random.normal(k_co, (B, 3), dtype=jnp.float32)

    out = jax.block_until_ready(atom_embedding(atom_types, chirals, coordinates, params))
    ref = (params["atom_emb"][atom_types] + params["chiral_emb"][chirals]
           + _coord_lin_ref(coordinates, params))          # [B,D] broadcasts on axis L
    assert out.shape == (B, L, D)
    assert bool(jnp.all(jnp.isfinite(out)))
    assert float(jnp.max(jnp.abs(out - ref))) < 1e-4

    # --- 2) Per-atom coordinates [B, L, 3], multi-block flattened grid.
    B2, L2 = 2, 16
    at2 = jax.random.randint(k_at, (B2, L2), 0, ATOM_VOC, dtype=jnp.int32)
    ch2 = jax.random.randint(k_ch, (B2, L2), 0, CHIRAL_VOC, dtype=jnp.int32)
    co2 = jax.random.normal(k_co3, (B2, L2, 3), dtype=jnp.float32)
    out2 = jax.block_until_ready(
        atom_embedding(at2, ch2, co2, params, token_tile=16))
    ref2 = (params["atom_emb"][at2] + params["chiral_emb"][ch2]
            + _coord_lin_ref(co2, params))
    assert out2.shape == (B2, L2, D)
    assert float(jnp.max(jnp.abs(out2 - ref2))) < 1e-4

    # --- 3) Non-divisible token count (B*L = 24, tile 16): masked edge block.
    B3, L3 = 3, 8
    at3 = jax.random.randint(k_at, (B3, L3), 0, ATOM_VOC, dtype=jnp.int32)
    ch3 = jax.random.randint(k_ch, (B3, L3), 0, CHIRAL_VOC, dtype=jnp.int32)
    co3 = jax.random.normal(k_co3, (B3, L3, 3), dtype=jnp.float32)
    out3 = jax.block_until_ready(
        atom_embedding(at3, ch3, co3, params, token_tile=16))
    ref3 = (params["atom_emb"][at3] + params["chiral_emb"][ch3]
            + _coord_lin_ref(co3, params))
    assert out3.shape == (B3, L3, D)
    assert float(jnp.max(jnp.abs(out3 - ref3))) < 1e-4

    # --- 4) bf16 output variant (halves the dominant HBM write).
    out_bf16 = jax.block_until_ready(
        atom_embedding(at2, ch2, co2, params, out_dtype=jnp.bfloat16, token_tile=16))
    assert out_bf16.dtype == jnp.bfloat16
    assert float(jnp.max(jnp.abs(out_bf16.astype(jnp.float32) - ref2))) < 0.1

    print("KERNEL_OK")
</pallas_src>

<mosaic_0001>
module attributes {stable_mosaic.version = 11 : i64} {
  func.func @_atom_embedding_kernel(%arg0: i32, %arg1: memref<64x2xi32, #tpu.memory_space<vmem>>, %arg2: memref<64x3xf32, #tpu.memory_space<vmem>>, %arg3: memref<20x128xf32, #tpu.memory_space<vmem>>, %arg4: memref<3x128xf32, #tpu.memory_space<vmem>>, %arg5: memref<1x128xf32, #tpu.memory_space<vmem>>, %arg6: memref<64x128xf32, #tpu.memory_space<vmem>>) attributes {dimension_semantics = [#tpu.dimension_semantics<parallel>], iteration_bounds = array<i64: 1>, scalar_prefetch = 0 : i64, scratch_operands = 0 : i64, tpu.core_type = #tpu.core_type<tc>, window_params = [{transform_indices = @transform_0, window_bounds = array<i64: 64, 2>}, {transform_indices = @transform_1, window_bounds = array<i64: 64, 3>}, {pipeline_mode = #tpu.pipeline_mode<synchronous>, transform_indices = @transform_2, window_bounds = array<i64: 20, 128>}, {pipeline_mode = #tpu.pipeline_mode<synchronous>, transform_indices = @transform_3, window_bounds = array<i64: 3, 128>}, {pipeline_mode = #tpu.pipeline_mode<synchronous>, transform_indices = @transform_4, window_bounds = array<i64: 1, 128>}, {transform_indices = @transform_5, window_bounds = array<i64: 64, 128>}]} {
    %c0 = arith.constant 0 : index
    %c0_0 = arith.constant 0 : index
    %0 = vector.load %arg3[%c0, %c0_0] : memref<20x128xf32, #tpu.memory_space<vmem>>, vector<20x128xf32>
    %c0_1 = arith.constant 0 : index
    %c0_2 = arith.constant 0 : index
    %1 = vector.load %arg4[%c0_1, %c0_2] : memref<3x128xf32, #tpu.memory_space<vmem>>, vector<1x128xf32>
    %c1 = arith.constant 1 : index
    %c0_3 = arith.constant 0 : index
    %2 = vector.load %arg4[%c1, %c0_3] : memref<3x128xf32, #tpu.memory_space<vmem>>, vector<1x128xf32>
    %c2 = arith.constant 2 : index
    %c0_4 = arith.constant 0 : index
    %3 = vector.load %arg4[%c2, %c0_4] : memref<3x128xf32, #tpu.memory_space<vmem>>, vector<1x128xf32>
    %c0_5 = arith.constant 0 : index
    %c0_6 = arith.constant 0 : index
    %4 = vector.load %arg5[%c0_5, %c0_6] : memref<1x128xf32, #tpu.memory_space<vmem>>, vector<1x128xf32>
    %c0_7 = arith.constant 0 : index
    %c0_8 = arith.constant 0 : index
    %5 = vector.load %arg1[%c0_7, %c0_8] : memref<64x2xi32, #tpu.memory_space<vmem>>, vector<64x2xi32>
    %6 = tpu.iota {dimensions = array<i32: 1>} : vector<64x20xi32>
    %7 = vector.extract_strided_slice %5 {offsets = [0, 0], sizes = [64, 1], strides = [1, 1]} : vector<64x2xi32> to vector<64x1xi32>
    %8 = vector.broadcast %7 : vector<64x1xi32> to vector<64x20xi32>
    %9 = arith.cmpi eq, %8, %6 : vector<64x20xi32>
    %10 = arith.extui %9 : vector<64x20xi1> to vector<64x20xi32>
    %11 = arith.sitofp %10 : vector<64x20xi32> to vector<64x20xf32>
    %12 = vector.extract_strided_slice %5 {offsets = [0, 1], sizes = [64, 1], strides = [1, 1]} : vector<64x2xi32> to vector<64x1xi32>
    %13 = vector.broadcast %12 : vector<64x1xi32> to vector<64x20xi32>
    %14 = arith.cmpi eq, %13, %6 : vector<64x20xi32>
    %15 = arith.extui %14 : vector<64x20xi1> to vector<64x20xi32>
    %16 = arith.sitofp %15 : vector<64x20xi32> to vector<64x20xf32>
    %17 = arith.addf %11, %16 : vector<64x20xf32>
    %cst = arith.constant dense<0.000000e+00> : vector<64x128xf32>
    %18 = tpu.matmul %17, %0, %cst {dimension_numbers = #tpu.dot_dimension_numbers<[1], [0], [0], [1], [0, 0, 1, 1], [], []>, precision = #tpu.contract_precision<fp32>} : vector<64x20xf32>, vector<20x128xf32>, vector<64x128xf32> -> vector<64x128xf32>
    %c0_9 = arith.constant 0 : index
    %c0_10 = arith.constant 0 : index
    %19 = vector.load %arg2[%c0_9, %c0_10] : memref<64x3xf32, #tpu.memory_space<vmem>>, vector<64x3xf32>
    %20 = vector.extract_strided_slice %19 {offsets = [0, 0], sizes = [64, 1], strides = [1, 1]} : vector<64x3xf32> to vector<64x1xf32>
    %21 = vector.broadcast %20 : vector<64x1xf32> to vector<64x128xf32>
    %22 = vector.broadcast %1 : vector<1x128xf32> to vector<64x128xf32>
    %23 = arith.mulf %21, %22 : vector<64x128xf32>
    %24 = vector.extract_strided_slice %19 {offsets = [0, 1], sizes = [64, 1], strides = [1, 1]} : vector<64x3xf32> to vector<64x1xf32>
    %25 = vector.broadcast %24 : vector<64x1xf32> to vector<64x128xf32>
    %26 = vector.broadcast %2 : vector<1x128xf32> to vector<64x128xf32>
    %27 = arith.mulf %25, %26 : vector<64x128xf32>
    %28 = arith.addf %23, %27 : vector<64x128xf32>
    %29 = vector.extract_strided_slice %19 {offsets = [0, 2], sizes = [64, 1], strides = [1, 1]} : vector<64x3xf32> to vector<64x1xf32>
    %30 = vector.broadcast %29 : vector<64x1xf32> to vector<64x128xf32>
    %31 = vector.broadcast %3 : vector<1x128xf32> to vector<64x128xf32>
    %32 = arith.mulf %30, %31 : vector<64x128xf32>
    %33 = arith.addf %28, %32 : vector<64x128xf32>
    %34 = vector.broadcast %4 : vector<1x128xf32> to vector<64x128xf32>
    %35 = arith.addf %33, %34 : vector<64x128xf32>
    %36 = arith.addf %18, %35 : vector<64x128xf32>
    %c0_11 = arith.constant 0 : index
    %c0_12 = arith.constant 0 : index
    %37 = vector.load %arg6[%c0_11, %c0_12] : memref<64x128xf32, #tpu.memory_space<vmem>>, vector<64x128xf32>
    tpu.vector_store %arg6[%c0_11, %c0_12], %36 {strides = array<i32>} : memref<64x128xf32, #tpu.memory_space<vmem>>, vector<64x128xf32>,
    return
  }
  func.func @transform_0(%arg0: i32) -> (i32, i32) {
    %c0_i32 = arith.constant 0 : i32
    %c0_i32_0 = arith.constant 0 : i32
    return %arg0, %c0_i32 : i32, i32
  }
  func.func @transform_1(%arg0: i32) -> (i32, i32) {
    %c0_i32 = arith.constant 0 : i32
    %c0_i32_0 = arith.constant 0 : i32
    return %arg0, %c0_i32 : i32, i32
  }
  func.func @transform_2(%arg0: i32) -> (i32, i32) {
    %c0_i32 = arith.constant 0 : i32
    %c0_i32_0 = arith.constant 0 : i32
    %c0_i32_1 = arith.constant 0 : i32
    return %c0_i32, %c0_i32_0 : i32, i32
  }
  func.func @transform_3(%arg0: i32) -> (i32, i32) {
    %c0_i32 = arith.constant 0 : i32
    %c0_i32_0 = arith.constant 0 : i32
    %c0_i32_1 = arith.constant 0 : i32
    return %c0_i32, %c0_i32_0 : i32, i32
  }
  func.func @transform_4(%arg0: i32) -> (i32, i32) {
    %c0_i32 = arith.constant 0 : i32
    %c0_i32_0 = arith.constant 0 : i32
    %c0_i32_1 = arith.constant 0 : i32
    return %c0_i32, %c0_i32_0 : i32, i32
  }
  func.func @transform_5(%arg0: i32) -> (i32, i32) {
    %c0_i32 = arith.constant 0 : i32
    %c0_i32_0 = arith.constant 0 : i32
    return %arg0, %c0_i32 : i32, i32
  }
}

</mosaic_0001>

<bundles_post_ra>
// kernel: tpu_custom_call.1
= control target key start
LH: loop header
LB: loop body
LE: loop exit
PB: predicated region body
PF: predicated region fallthrough
CT: control target
= control target key end

     0   :  { %v1453_v2 = vmov 0   ;;  %s1725_s0 = inlined_call_operand.vmem [shape: s32[64,2], index: 0, kind: input, shape index: {}]   ;;  %s1726_s1 = inlined_call_operand.vmem [shape: f32[64,3], index: 1, kind: input, shape index: {}]   ;;  %s1727_s2 = inlined_call_operand.vmem [shape: f32[20,128], index: 2, kind: input, shape index: {}]   ;;  %s1728_s3 = inlined_call_operand.vmem [shape: f32[3,128], index: 3, kind: input, shape index: {}]   ;;  %s1729_s4 = inlined_call_operand.vmem [shape: f32[1,128], index: 4, kind: input, shape index: {}]   ;;  %s1730_s5 = inlined_call_operand.hbm [shape: f32[64,128], index: 5, kind: output, shape index: {}]  }
   0x1   :  { %v29_v0 = vld [vmem:[%s1725_s0 + $0x8] sm:$0xff]  ;;  %v28_v1 = vld [vmem:[%s1725_s0] sm:$0xff]  ;;  %1421 = vset.pattern.permute.xlu1 %v1453_v2  ;;  %1419 = vset.pattern.permute.xlu0 %v1453_v2 }
   0x2   :  { %42 = vperm.xlu1 %1421, %v29_v0   ;;  %39 = vperm.xlu0 %1419, %v28_v1  }
   0x3   :  { %10 = vsyncpa [#allocation3], 0  ;;  %v1454_v3 = vmov 1   ;;  %v30_v4 = vld [vmem:[%s1725_s0 + $0x10] sm:$0xff]  ;;  %v21_v5 = vld [vmem:[%s1727_s2] sm:$0xff]  ;;  %vm345_vm0 = vcmask 1043456   ;;  %v36_v38 = vlaneseq }
   0x4   :  { %v22_v6 = vld [vmem:[%s1727_s2 + $0x8] sm:$0xff]  ;;  %v350_v7 = vand.u32 4294901760, %v21_v5  ;;  %v31_v10 = vld [vmem:[%s1725_s0 + $0x18] sm:$0xff]  ;;  %v23_v11 = vld [vmem:[%s1727_s2 + $0x10] sm:$0xf]  ;;  %v1455_v37 = vmov 2  }
   0x5   :  { %v353_v8 = vand.u32 4294901760, %v22_v6  ;;  %v1518_v12 = vsel %vm345_vm0, %v23_v11, 0  ;;  %v32_v14 = vld [vmem:[%s1725_s0 + $0x20] sm:$0xff]  ;;  %v33_v15 = vld [vmem:[%s1725_s0 + $0x28] sm:$0xff]  ;;  %v34_v16 = vld [vmem:[%s1725_s0 + $0x30] sm:$0xff]  ;;  %v1574_v39 = vand.u32 127, %v36_v38 }
   0x6   :  { %1422 = vset.pattern.permute.xlu1 %v1454_v3  ;;  %1420 = vset.pattern.permute.xlu0 %v1454_v3  ;;  %v1522_v13 = vand.u32 4294901760, %v1518_v12  ;;  %v35_v17 = vld [vmem:[%s1725_s0 + $0x38] sm:$0xff]  ;;  %v142_v18 = vld [vmem:[%s1726_s1] sm:$0xff]  ;;  %v143_v19 = vld [vmem:[%s1726_s1 + $0x8] sm:$0xff]  ;;  %v499_v20 = vsub.f32 %v21_v5, %v350_v7  ;;  %vm320_vm3 = vcmask 162816   ;;  %v1456_v45 = vmov 0.0  }
   0x7   :  { %90 = vperm.xlu1 %1422, %v29_v0   ;;  %87 = vperm.xlu0 %1420, %v28_v1   ;;  %v1507_v9 = vpack.c.bf16 %v353_v8, %v350_v7  ;;  %v506_v21 = vsub.f32 %v22_v6, %v353_v8  ;;  %v144_v22 = vld [vmem:[%s1726_s1 + $0x10] sm:$0xff]  ;;  %v146_v23 = vld [vmem:[%s1726_s1 + $0x20] sm:$0xff]  ;;  %v145_v29 = vld [vmem:[%s1726_s1 + $0x18] sm:$0xff] }
   0x8   :  { %v500_v24 = vand.u32 4294901760, %v499_v20  ;;  %v148_v30 = vld [vmem:[%s1726_s1 + $0x30] sm:$0xff]  ;;  %v147_v34 = vld [vmem:[%s1726_s1 + $0x28] sm:$0xff]  ;;  %v149_v35 = vld [vmem:[%s1726_s1 + $0x38] sm:$0xff]  ;;  %v1582_v44 = vsub.f32 %v1518_v12, %v1522_v13 }
   0x9   :  { %1353 = vmatprep.subr.bf16.mxu0 %v1507_v9  ;;  %1341 = vmatprep.subr.bf16.mxu1 %v1507_v9  ;;  %v507_v25 = vand.u32 4294901760, %v506_v21  ;;  %v1571_v36 = vpack.c.bf16 %v506_v21, %v499_v20 }
   0xa   :  { %1355 = vmatpush3.bf16.msra.mxu0 %v1507_v9  ;;  %1343 = vmatpush3.bf16.msra.mxu1 %v1507_v9  ;;  %v501_v26 = vsub.f32 %v499_v20, %v500_v24  ;;  %v514_v56 = vand.u32 4294901760, %v1582_v44 }
   0xb   :  { %1423 = vset.pattern.permute.xlu1 %v1453_v2  ;;  %93 = vperm.xlu0 %1420, %v30_v4   ;;  %v508_v27 = vsub.f32 %v506_v21, %v507_v25  ;;  %v1552_v28 = vpack.c.bf16 %v507_v25, %v500_v24 }
   0xc   :  { %45 = vperm.xlu1 %1423, %v30_v4   ;;  %1290 = vmatprep.subr.mxu0 %v1522_v13  ;;  %v502_v31 = vand.u32 4294901760, %v501_v26 }
   0xd   :  { %1236 = vmatprep.subr.mxu1 %v1522_v13  ;;  %v509_v32 = vand.u32 4294901760, %v508_v27 }
   0xe   :  { %1291 = vmatpush3.msra.mxu0 %v1522_v13  ;;  %1237 = vmatpush3.msra.mxu1 %v1522_v13 }
   0xf   :  { %96 = vperm.xlu0 %1420, %v31_v10   ;;  %1357 = vmatprep.subr.bf16.mxu0 %v1552_v28  ;;  %v1561_v33 = vpack.c.bf16 %v509_v32, %v502_v31 }
  0x10   :  { %48 = vperm.xlu1 %1423, %v31_v10  }
  0x11   :  { %1345 = vmatprep.subr.bf16.mxu1 %v1561_v33 }
  0x13   :  { %99 = vperm.xlu0 %1420, %v32_v14  }
  0x14   :  { %51 = vperm.xlu1 %1423, %v32_v14  }
  0x17   :  { %102 = vperm.xlu0 %1420, %v33_v15  }
  0x18   :  { %54 = vperm.xlu1 %1423, %v33_v15  }
  0x1b   :  { %105 = vperm.xlu0 %1420, %v34_v16  }
  0x1c   :  { %57 = vperm.xlu1 %1423, %v34_v16  }
  0x1f   :  { %108 = vperm.xlu0 %1420, %v35_v17  }
  0x20   :  { %60 = vperm.xlu1 %1423, %v35_v17  }
  0x23   :  { %1424 = vset.pattern.permute.xlu0 %v1453_v2  ;;  %v515_v2 = vsub.f32 %v1582_v44, %v514_v56 }
  0x24   :  { %152 = vperm.xlu1 %1423, %v142_v18   ;;  %157 = vperm.xlu0 %1424, %v143_v19  }
  0x25   :  { %v516_v17 = vand.u32 4294901760, %v515_v2 }
  0x28   :  { %162 = vperm.xlu1 %1423, %v144_v22   ;;  %172 = vperm.xlu0 %1424, %v146_v23  }
  0x2c   :  { %167 = vperm.xlu1 %1423, %v145_v29   ;;  %182 = vperm.xlu0 %1424, %v148_v30  }
  0x30   :  { %177 = vperm.xlu1 %1423, %v147_v34   ;;  %1425 = vset.pattern.permute.xlu0 %v1454_v3 }
  0x31   :  { %203 = vperm.xlu0 %1425, %v142_v18  }
  0x34   :  { %187 = vperm.xlu1 %1423, %v149_v35  }
  0x35   :  { %215 = vperm.xlu0 %1425, %v145_v29  }
  0x38   :  { %1426 = vset.pattern.permute.xlu1 %v1454_v3 }
  0x39   :  { %207 = vperm.xlu1 %1426, %v143_v19   ;;  %223 = vperm.xlu0 %1425, %v147_v34  }
  0x3d   :  { %211 = vperm.xlu1 %1426, %v144_v22   ;;  %231 = vperm.xlu0 %1425, %v149_v35  }
  0x41   :  { %219 = vperm.xlu1 %1426, %v146_v23   ;;  %1428 = vset.pattern.permute.xlu0 %v1455_v37 }
  0x42   :  { %259 = vperm.xlu0 %1428, %v143_v19  }
  0x45   :  { %227 = vperm.xlu1 %1426, %v148_v30  }
  0x46   :  { %271 = vperm.xlu0 %1428, %v146_v23  }
  0x49   :  { %1427 = vset.pattern.permute.xlu1 %v1455_v37 }
  0x4a   :  { %255 = vperm.xlu1 %1427, %v142_v18   ;;  %279 = vperm.xlu0 %1428, %v148_v30  }
  0x4e   :  { %263 = vperm.xlu1 %1427, %v144_v22  }
  0x52   :  { %267 = vperm.xlu1 %1427, %v145_v29  }
  0x56   :  { %275 = vperm.xlu1 %1427, %v147_v34  }
  0x5a   :  { %283 = vperm.xlu1 %1427, %v149_v35  }
  0x81   :  { %v43_v40 = vpop.permute.xlu1 %42  ;;  %v40_v41 = vpop.permute.xlu0 %39 }
  0x82   :  { %vm63_vm1 = vcmp.eq.s32.totalorder %v43_v40, %v1574_v39  ;;  %vm62_vm2 = vcmp.eq.s32.totalorder %v40_v41, %v1574_v39 }
  0x83   :  { %v1147_v46 = vsel %vm63_vm1, 1.0, %v1456_v45  ;;  %v1146_v47 = vsel %vm62_vm2, 1.0, %v1456_v45 }
  0x86   :  { %v91_v42 = vpop.permute.xlu1 %90  ;;  %v88_v43 = vpop.permute.xlu0 %87 }
  0x87   :  { %vm111_vm4 = vcmp.eq.s32.totalorder %v91_v42, %v1574_v39  ;;  %vm110_vm5 = vcmp.eq.s32.totalorder %v88_v43, %v1574_v39 }
  0x88   :  { %v1155_v48 = vsel %vm111_vm4, 1.0, %v1456_v45  ;;  %v1154_v49 = vsel %vm110_vm5, 1.0, %v1456_v45 }
  0x89   :  { %v135_v50 = vadd.f32 %v1155_v48, %v1147_v46  ;;  %v134_v51 = vadd.f32 %v1154_v49, %v1146_v47 }
  0x8a   :  { %v94_v52 = vpop.permute.xlu0 %93 }
  0x8b   :  { %v325_v53 = vsel %vm320_vm3, %v135_v50, 0  ;;  %v322_v54 = vsel %vm320_vm3, %v134_v51, 0  ;;  %vm112_vm6 = vcmp.eq.s32.totalorder %v94_v52, %v1574_v39  ;;  %v46_v55 = vpop.permute.xlu1 %45 }
  0x8c   :  { %v1592_v57 = vand.u32 4294901760, %v325_v53  ;;  %v1594_v58 = vand.u32 4294901760, %v322_v54  ;;  %v1156_v59 = vsel %vm112_vm6, 1.0, %v1456_v45  ;;  %vm64_vm7 = vcmp.eq.s32.totalorder %v46_v55, %v1574_v39 }
  0x8d   :  { %v1148_v60 = vsel %vm64_vm7, 1.0, %v1456_v45 }
  0x8e   :  { %v1600_v61 = vsub.f32 %v325_v53, %v1592_v57  ;;  %v1603_v62 = vsub.f32 %v322_v54, %v1594_v58  ;;  %v136_v63 = vadd.f32 %v1156_v59, %v1148_v60  ;;  %v97_v0 = vpop.permute.xlu0 %96 }
  0x8f   :  { %vm113_vm8 = vcmp.eq.s32.totalorder %v97_v0, %v1574_v39  ;;  %v49_v1 = vpop.permute.xlu1 %48 }
  0x90   :  { %v328_v3 = vsel %vm320_vm3, %v136_v63, 0  ;;  %v1157_v4 = vsel %vm113_vm8, 1.0, %v1456_v45  ;;  %vm65_vm9 = vcmp.eq.s32.totalorder %v49_v1, %v1574_v39  ;;  %v419_v5 = vand.u32 4294901760, %v1603_v62 }
  0x91   :  { %v1611_v6 = vand.u32 4294901760, %v328_v3  ;;  %v1149_v7 = vsel %vm65_vm9, 1.0, %v1456_v45  ;;  %v429_v8 = vand.u32 4294901760, %v1600_v61 }
  0x92   :  { %v137_v10 = vadd.f32 %v1157_v4, %v1149_v7  ;;  %1292 = vmatprep.mubr.f32.mxu0 %v419_v5  ;;  %v100_v11 = vpop.permute.xlu0 %99  ;;  %v420_v12 = vsub.f32 %v1603_v62, %v419_v5 }
  0x93   :  { %v1617_v14 = vsub.f32 %v328_v3, %v1611_v6  ;;  %vm114_vm10 = vcmp.eq.s32.totalorder %v100_v11, %v1574_v39  ;;  %v52_v15 = vpop.permute.xlu1 %51  ;;  %1293 = vmatmul.mubr.f32.vlgmr.msra.gmra.mrb[0].mxu0 %v429_v8  ;;  %v430_v16 = vsub.f32 %v1600_v61, %v429_v8 }
  0x94   :  { %v331_v18 = vsel %vm320_vm3, %v137_v10, 0  ;;  %v1158_v19 = vsel %vm114_vm10, 1.0, %v1456_v45  ;;  %vm66_vm11 = vcmp.eq.s32.totalorder %v52_v15, %v1574_v39  ;;  %v421_v20 = vand.u32 4294901760, %v420_v12  ;;  %1359 = vmatpush3.bf16.msra.mxu0 %v1552_v28 }
  0x95   :  { %v1625_v21 = vand.u32 4294901760, %v331_v18  ;;  %v1150_v22 = vsel %vm66_vm11, 1.0, %v1456_v45  ;;  %v431_v23 = vand.u32 4294901760, %v430_v16  ;;  %v439_v24 = vand.u32 4294901760, %v1617_v14  ;;  %1308 = vmatprep.subr.mxu0 %v514_v56 }
  0x96   :  { %v138_v25 = vadd.f32 %v1158_v19, %v1150_v22  ;;  %1238 = vmatprep.mubr.f32.mxu1 %v421_v20  ;;  %v103_v26 = vpop.permute.xlu0 %102 }
  0x97   :  { %v1630_v27 = vsub.f32 %v331_v18, %v1625_v21  ;;  %vm115_vm12 = vcmp.eq.s32.totalorder %v103_v26, %v1574_v39  ;;  %v55_v29 = vpop.permute.xlu1 %54  ;;  %1239 = vmatmul.mubr.f32.vlgmr.msra.gmra.mrb[0].mxu1 %v431_v23  ;;  %1295 = vmatprep.mubr.f32.mxu0 %v439_v24  ;;  %v440_v28 = vsub.f32 %v1617_v14, %v439_v24  ;;  %v1163_v26 = vld [vmem:[%s1728_s3 + $0x1] ss:$0 sm:$0xff] }
  0x98   :  { %v334_v30 = vsel %vm320_vm3, %v138_v25, 0  ;;  %v1159_v31 = vsel %vm115_vm12, 1.0, %v1456_v45  ;;  %vm67_vm13 = vcmp.eq.s32.totalorder %v55_v29, %v1574_v39  ;;  %1347 = vmatpush3.bf16.msra.mxu1 %v1561_v33  ;;  %1309 = vmatpush3.msra.mxu0 %v514_v56  ;;  %v1162_v25 = vld [vmem:[%s1728_s3] ss:$0 sm:$0xff] }
  0x99   :  { %v1638_v32 = vand.u32 4294901760, %v334_v30  ;;  %v1151_v34 = vsel %vm67_vm13, 1.0, %v1456_v45  ;;  %v441_v35 = vand.u32 4294901760, %v440_v28  ;;  %v449_v37 = vand.u32 4294901760, %v1630_v27  ;;  %1254 = vmatprep.subr.mxu1 %v516_v17  ;;  %1361 = vmatprep.subr.bf16.mxu0 %v1507_v9 }
  0x9a   :  { %v139_v38 = vadd.f32 %v1159_v31, %v1151_v34  ;;  %v106_v40 = vpop.permute.xlu0 %105  ;;  %v1164_v31 = vld [vmem:[%s1728_s3 + $0x2] ss:$0 sm:$0xff] }
  0x9b   :  { %v1644_v41 = vsub.f32 %v334_v30, %v1638_v32  ;;  %vm116_vm14 = vcmp.eq.s32.totalorder %v106_v40, %v1574_v39  ;;  %v58_v42 = vpop.permute.xlu1 %57  ;;  %1241 = vmatprep.mubr.f32.mxu1 %v441_v35  ;;  %1296 = vmatmul.mubr.f32.gmra.mrb[2].mxu0 %v449_v37  ;;  %v450_v33 = vsub.f32 %v1630_v27, %v449_v37 }
  0x9c   :  { %v337_v43 = vsel %vm320_vm3, %v139_v38, 0  ;;  %v1160_v46 = vsel %vm116_vm14, 1.0, %v1456_v45  ;;  %vm68_vm15 = vcmp.eq.s32.totalorder %v58_v42, %v1574_v39  ;;  %1255 = vmatpush3.msra.mxu1 %v516_v17 }
  0x9d   :  { %v1651_v47 = vand.u32 4294901760, %v337_v43  ;;  %v1152_v48 = vsel %vm68_vm15, 1.0, %v1456_v45  ;;  %v451_v49 = vand.u32 4294901760, %v450_v33  ;;  %v459_v50 = vand.u32 4294901760, %v1644_v41  ;;  %1349 = vmatprep.subr.bf16.mxu1 %v1571_v36 }
  0x9e   :  { %v140_v51 = vadd.f32 %v1160_v46, %v1152_v48  ;;  %v109_v52 = vpop.permute.xlu0 %108 }
  0x9f   :  { %v1657_v53 = vsub.f32 %v337_v43, %v1651_v47  ;;  %vm117_vm0 = vcmp.eq.s32.totalorder %v109_v52, %v1574_v39  ;;  %v61_v54 = vpop.permute.xlu1 %60  ;;  %1242 = vmatmul.mubr.f32.gmra.mrb[2].mxu1 %v451_v49  ;;  %1298 = vmatprep.mubr.f32.mxu0 %v459_v50  ;;  %v460_v55 = vsub.f32 %v1644_v41, %v459_v50 }
  0xa0   :  { %v340_v56 = vsel %vm320_vm3, %v140_v51, 0  ;;  %v1161_v59 = vsel %vm117_vm0, 1.0, %v1456_v45  ;;  %vm69_vm1 = vcmp.eq.s32.totalorder %v61_v54, %v1574_v39 }
  0xa1   :  { %v477_v60 = vand.u32 4294901760, %v340_v56  ;;  %v1153_v63 = vsel %vm69_vm1, 1.0, %v1456_v45  ;;  %v461_v0 = vand.u32 4294901760, %v460_v55  ;;  %v469_v1 = vand.u32 4294901760, %v1657_v53 }
  0xa2   :  { %v141_v2 = vadd.f32 %v1161_v59, %v1153_v63 }
  0xa3   :  { %v478_v3 = vsub.f32 %v340_v56, %v477_v60  ;;  %1244 = vmatprep.mubr.f32.mxu1 %v461_v0  ;;  %1299 = vmatmul.mubr.f32.gmra.mrb[4].mxu0 %v469_v1  ;;  %v470_v4 = vsub.f32 %v1657_v53, %v469_v1 }
  0xa4   :  { %v343_v5 = vsel %vm320_vm3, %v141_v2, 0 }
  0xa5   :  { %v487_v7 = vand.u32 4294901760, %v343_v5  ;;  %v471_v8 = vand.u32 4294901760, %v470_v4  ;;  %v479_v10 = vand.u32 4294901760, %v478_v3 }
  0xa7   :  { %v488_v11 = vsub.f32 %v343_v5, %v487_v7  ;;  %1245 = vmatmul.mubr.f32.gmra.mrb[4].mxu1 %v471_v8  ;;  %1301 = vmatprep.mubr.f32.mxu0 %v479_v10  ;;  %v480_v39 = vsub.f32 %v478_v3, %v479_v10 }
  0xa9   :  { %v481_v12 = vand.u32 4294901760, %v480_v39  ;;  %v489_v45 = vand.u32 4294901760, %v488_v11 }
  0xab   :  { %1247 = vmatprep.mubr.f32.mxu1 %v481_v12  ;;  %1302 = vmatmul.mubr.f32.gmra.mrb[6].mxu0 %v489_v45  ;;  %v490_v15 = vsub.f32 %v488_v11, %v489_v45 }
  0xac   :  { %1310 = vmatprep.mubr.f32.mxu0 %v1594_v58 }
  0xad   :  { %v491_v16 = vand.u32 4294901760, %v490_v15 }
  0xaf   :  { %1248 = vmatmul.mubr.f32.gmra.mrb[6].mxu1 %v491_v16  ;;  %1311 = vmatmul.mubr.f32.vlgmr.msra.gmra.mrb[0].mxu0 %v1592_v57 }
  0xb0   :  { %1256 = vmatprep.mubr.f32.mxu1 %v1594_v58  ;;  %1313 = vmatprep.mubr.f32.mxu0 %v1611_v6 }
  0xb1   :  { %1363 = vmatpush3.bf16.msra.mxu0 %v1507_v9  ;;  %v153_v9 = vpop.permute.xlu1 %152 }
  0xb2   :  { %1326 = vmatprep.subr.mxu0 %v1522_v13  ;;  %v194_v37 = vmul.f32 %v1162_v25, %v153_v9 }
  0xb3   :  { %1257 = vmatmul.mubr.f32.vlgmr.msra.gmra.mrb[0].mxu1 %v1592_v57  ;;  %1314 = vmatmul.mubr.f32.gmra.mrb[2].mxu0 %v1625_v21 }
  0xb4   :  { %1351 = vmatpush3.bf16.msra.mxu1 %v1571_v36  ;;  %1259 = vmatprep.mubr.f32.mxu1 %v1611_v6 }
  0xb5   :  { %1316 = vmatprep.mubr.f32.mxu0 %v1638_v32  ;;  %1272 = vmatprep.subr.mxu1 %v1582_v44 }
  0xb6   :  { %1327 = vmatpush3.msra.mxu0 %v1522_v13  ;;  %v163_v13 = vpop.permute.xlu1 %162 }
  0xb7   :  { %1260 = vmatmul.mubr.f32.gmra.mrb[2].mxu1 %v1625_v21  ;;  %1317 = vmatmul.mubr.f32.gmra.mrb[4].mxu0 %v1651_v47  ;;  %v196_v46 = vmul.f32 %v1162_v25, %v163_v13 }
  0xb8   :  { %1262 = vmatprep.mubr.f32.mxu1 %v1638_v32  ;;  %1319 = vmatprep.mubr.f32.mxu0 %v477_v60 }
  0xb9   :  { %1273 = vmatpush3.msra.mxu1 %v1582_v44 }
  0xba   :  { %v168_v36 = vpop.permute.xlu1 %167 }
  0xbb   :  { %1263 = vmatmul.mubr.f32.gmra.mrb[4].mxu1 %v1651_v47  ;;  %1320 = vmatmul.mubr.f32.gmra.mrb[6].mxu0 %v487_v7 }
  0xbc   :  { %1265 = vmatprep.mubr.f32.mxu1 %v477_v60  ;;  %1328 = vmatprep.mubr.f32.mxu0 %v1594_v58  ;;  %v158_v58 = vpop.permute.xlu0 %157 }
  0xbe   :  { %v178_v44 = vpop.permute.xlu1 %177 }
  0xbf   :  { %1266 = vmatmul.mubr.f32.gmra.mrb[6].mxu1 %v487_v7  ;;  %1329 = vmatmul.mubr.f32.vlgmr.msra.gmra.mrb[0].mxu0 %v1592_v57  ;;  %v199_v2 = vmul.f32 %v1162_v25, %v178_v44 }
  0xc0   :  { %1274 = vmatprep.mubr.f32.mxu1 %v1603_v62  ;;  %1331 = vmatprep.mubr.f32.mxu0 %v1611_v6  ;;  %v173_v62 = vpop.permute.xlu0 %172 }
  0xc1   :  { %v198_v50 = vmul.f32 %v1162_v25, %v173_v62 }
  0xc2   :  { %v1698_v57 = vpop.permute.xlu1 %187 }
  0xc3   :  { %1275 = vmatmul.mubr.f32.vlgmr.msra.gmra.mrb[0].mxu1 %v1600_v61  ;;  %1332 = vmatmul.mubr.f32.gmra.mrb[2].mxu0 %v1625_v21 }
  0xc4   :  { %1277 = vmatprep.mubr.f32.mxu1 %v1617_v14  ;;  %1334 = vmatprep.mubr.f32.mxu0 %v1638_v32  ;;  %v183_v14 = vpop.permute.xlu0 %182 }
  0xc5   :  { %v200_v63 = vmul.f32 %v1162_v25, %v183_v14 }
  0xc6   :  { %v208_v61 = vpop.permute.xlu1 %207 }
  0xc7   :  { %1278 = vmatmul.mubr.f32.gmra.mrb[2].mxu1 %v1630_v27  ;;  %1335 = vmatmul.mubr.f32.gmra.mrb[4].mxu0 %v1651_v47  ;;  %v195_v27 = vmul.f32 %v1162_v25, %v158_v58  ;;  %v239_v29 = vmul.f32 %v1163_v26, %v208_v61  ;;  %v197_v47 = vmul.f32 %v1162_v25, %v168_v36 }
  0xc8   :  { %1280 = vmatprep.mubr.f32.mxu1 %v1644_v41  ;;  %1337 = vmatprep.mubr.f32.mxu0 %v477_v60  ;;  %v204_v18 = vpop.permute.xlu0 %203  ;;  %v1165_v60 = vld [vmem:[%s1729_s4] ss:$0 sm:$0xff]  ;;  %v201_v61 = vmul.f32 %v1162_v25, %v1698_v57  ;;  %s1457_s4 = smov [#allocation2]  }
  0xc9   :  { %v238_v32 = vmul.f32 %v1163_v26, %v204_v18  ;;  %v247_v34 = vadd.f32 %v239_v29, %v195_v27  ;;  %s1135_s9 = sshll.u32 %s1457_s4, 4  ;;  %s1136_s9 = int_to_ptr.vmem [resolvable:$true] %s1135_s9 }
  0xca   :  { %v212_v6 = vpop.permute.xlu1 %211  ;;  %s1429_s10 = scalar_lea.vmem %s1136_s9, 1024  ;;  %p1434_p1 = scmp.lt.s32.totalorder %s1136_s9, %s1136_s9 }
  0xcb   :  { %1281 = vmatmul.mubr.f32.gmra.mrb[4].mxu1 %v1657_v53  ;;  %1338 = vmatmul.mubr.f32.gmra.mrb[6].mxu0 %v487_v7  ;;  %v246_v33 = vadd.f32 %v238_v32, %v194_v37  ;;  %v240_v43 = vmul.f32 %v1163_v26, %v212_v6  ;;  %p1430_p0 = scmp.ne.s32.totalorder %s1136_s9, %s1429_s10  ;;  %p1435_p2 = scmp.lt.s32.totalorder %s1429_s10, %s1429_s10 }
  0xcc   :  { %1283 = vmatprep.mubr.f32.mxu1 %v478_v3  ;;  %v216_v20 = vpop.permute.xlu0 %215 }
  0xcd   :  { %v241_v40 = vmul.f32 %v1163_v26, %v216_v20  ;;  %v248_v0 = vadd.f32 %v240_v43, %v196_v46  ;;  %p1436_p3 = por %p1435_p2, %p1434_p1 }
  0xce   :  { %v220_v17 = vpop.permute.xlu1 %219 }
  0xcf   :  { %1284 = vmatmul.mubr.f32.gmra.mrb[6].mxu1 %v488_v11  ;;  %v242_v51 = vmul.f32 %v1163_v26, %v220_v17  ;;  %v249_v55 = vadd.f32 %v241_v40, %v197_v47  ;;  %p1437_p4 = pnand %p1436_p3, %p1430_p0 }
  0xd0   :  { %v224_v22 = vpop.permute.xlu0 %223 }
  0xd1   :  { %v243_v56 = vmul.f32 %v1163_v26, %v224_v22  ;;  %v250_v10 = vadd.f32 %v242_v51, %v198_v50 }
  0xd2   :  { %v228_v19 = vpop.permute.xlu1 %227 }
  0xd3   :  { %v244_v1 = vmul.f32 %v1163_v26, %v228_v19  ;;  %v251_v16 = vadd.f32 %v243_v56, %v199_v2 }
  0xd4   :  { %v232_v24 = vpop.permute.xlu0 %231 }
  0xd5   :  { %v245_v9 = vmul.f32 %v1163_v26, %v232_v24  ;;  %v252_v62 = vadd.f32 %v244_v1, %v200_v63 }
  0xd6   :  { %v256_v21 = vpop.permute.xlu1 %255 }
  0xd7   :  { %v290_v38 = vmul.f32 %v1164_v31, %v256_v21  ;;  %v253_v29 = vadd.f32 %v245_v9, %v201_v61 }
  0xd8   :  { %v260_v30 = vpop.permute.xlu0 %259 }
  0xd9   :  { %v291_v35 = vmul.f32 %v1164_v31, %v260_v30  ;;  %v298_v52 = vadd.f32 %v290_v38, %v246_v33 }
  0xda   :  { %v264_v23 = vpop.permute.xlu1 %263 }
  0xdb   :  { %v299_v49 = vadd.f32 %v291_v35, %v247_v34  ;;  %v292_v53 = vmul.f32 %v1164_v31, %v264_v23  ;;  %v312_v15 = vadd.f32 %v1165_v60, %v298_v52 }
  0xdc   :  { %v272_v42 = vpop.permute.xlu0 %271 }
  0xdd   :  { %v313_v8 = vadd.f32 %v1165_v60, %v299_v49  ;;  %v300_v11 = vadd.f32 %v292_v53, %v248_v0  ;;  %v294_v39 = vmul.f32 %v1164_v31, %v272_v42 }
  0xde   :  { %v268_v28 = vpop.permute.xlu1 %267 }
  0xdf   :  { %v293_v48 = vmul.f32 %v1164_v31, %v268_v28  ;;  %v302_v19 = vadd.f32 %v294_v39, %v250_v10  ;;  %v314_v27 = vadd.f32 %v1165_v60, %v300_v11 }
  0xe0   :  { %v280_v7 = vpop.permute.xlu0 %279 }
  0xe1   :  { %v301_v3 = vadd.f32 %v293_v48, %v249_v55  ;;  %v296_v20 = vmul.f32 %v1164_v31, %v280_v7  ;;  %v316_v40 = vadd.f32 %v1165_v60, %v302_v19 }
  0xe2   :  { %v276_v41 = vpop.permute.xlu1 %275 }
  0xe3   :  { %v295_v4 = vmul.f32 %v1164_v31, %v276_v41  ;;  %v315_v18 = vadd.f32 %v1165_v60, %v301_v3  ;;  %v304_v34 = vadd.f32 %v296_v20, %v252_v62 }
  0xe5   :  { %v303_v6 = vadd.f32 %v295_v4, %v251_v16  ;;  %v318_v49 = vadd.f32 %v1165_v60, %v304_v34 }
  0xe6   :  { %v284_v5 = vpop.permute.xlu1 %283 }
  0xe7   :  { %v297_v14 = vmul.f32 %v1164_v31, %v284_v5  ;;  %v317_v32 = vadd.f32 %v1165_v60, %v303_v6 }
  0xe9   :  { %v305_v57 = vadd.f32 %v297_v14, %v253_v29 }
  0xeb   :  { %v319_v46 = vadd.f32 %v1165_v60, %v305_v57 }
 0x192   :  { %v1330_v54 = vpop.f32.mrb[0].mxu0 }
 0x193   :  { %v1076_v59 = vpop.f32.mrb[1].mxu0 }
 0x196   :  { %v1276_v12 = vpop.f32.mrb[0].mxu1  ;;  %v1333_v45 = vpop.f32.mrb[2].mxu0 }
 0x197   :  { %v1364_v13 = vadd.f32 %v1276_v12, %v313_v8  ;;  %v699_v36 = vpop.f32.mrb[1].mxu1  ;;  %v1088_v58 = vpop.f32.mrb[3].mxu0 }
 0x198   :  { %v1366_v44 = vadd.f32 %v699_v36, %v312_v15 }
 0x199   :  { %v1365_v17 = vadd.f32 %v1364_v13, %v1330_v54 }
 0x19a   :  { %v1367_v21 = vadd.f32 %v1366_v44, %v1076_v59  ;;  %v1279_v22 = vpop.f32.mrb[2].mxu1  ;;  %v1336_v23 = vpop.f32.mrb[4].mxu0 }
 0x19b   :  { %1123 = vst [vmem:[#allocation2 + $0x8] sm:$0xff] %v1365_v17  ;;  %v1368_v24 = vadd.f32 %v1279_v22, %v315_v18  ;;  %v713_v26 = vpop.f32.mrb[3].mxu1  ;;  %v1100_v28 = vpop.f32.mrb[5].mxu0 }
 0x19c   :  { %1122 = vst [vmem:[#allocation2] sm:$0xff] %v1367_v21  ;;  %v1370_v30 = vadd.f32 %v713_v26, %v314_v27 }
 0x19d   :  { %v1369_v25 = vadd.f32 %v1368_v24, %v1333_v45 }
 0x19e   :  { %v1371_v35 = vadd.f32 %v1370_v30, %v1088_v58  ;;  %v1282_v37 = vpop.f32.mrb[4].mxu1  ;;  %v1339_v38 = vpop.f32.mrb[6].mxu0 }
 0x19f   :  { %1125 = vst [vmem:[#allocation2 + $0x18] sm:$0xff] %v1369_v25  ;;  %v1372_v31 = vadd.f32 %v1282_v37, %v317_v32  ;;  %v727_v41 = vpop.f32.mrb[5].mxu1  ;;  %v1112_v42 = vpop.f32.mrb[7].mxu0 }
 0x1a0   :  { %1124 = vst [vmem:[#allocation2 + $0x10] sm:$0xff] %v1371_v35  ;;  %v1374_v33 = vadd.f32 %v727_v41, %v316_v40 }
 0x1a1   :  { %v1373_v43 = vadd.f32 %v1372_v31, %v1336_v23 }
 0x1a2   :  { %v1375_v47 = vadd.f32 %v1374_v33, %v1100_v28  ;;  %v1285_v48 = vpop.f32.mrb[6].mxu1 }
 0x1a3   :  { %1127 = vst [vmem:[#allocation2 + $0x28] sm:$0xff] %v1373_v43  ;;  %v1376_v50 = vadd.f32 %v1285_v48, %v319_v46  ;;  %v741_v51 = vpop.f32.mrb[7].mxu1 }
 0x1a4   :  { %1126 = vst [vmem:[#allocation2 + $0x20] sm:$0xff] %v1375_v47  ;;  %v1378_v52 = vadd.f32 %v741_v51, %v318_v49 }
 0x1a5   :  { %v1377_v53 = vadd.f32 %v1376_v50, %v1339_v38 }
 0x1a6   :  { %v1379_v54 = vadd.f32 %v1378_v52, %v1112_v42 }
 0x1a7   :  { %1129 = vst [vmem:[#allocation2 + $0x38] sm:$0xff] %v1377_v53 }
 0x1a8   :  { %1128 = vst [vmem:[#allocation2 + $0x30] sm:$0xff] %v1379_v54 }
 0x1a9   :  { %1440 = shalt.err (!%p1437_p4)
}
 0x1aa   :  { %s1441_s13 = scalar_lea.hbm %s1730_s5, 1024 }
 0x1ab   :  { %p1442_p5 = scmp.ne.s32.totalorder %s1730_s5, %s1441_s13  ;;  %p1445_p6 = scmp.lt.u32.totalorder %s1441_s13, %s1730_s5 }
 0x1ad   :  { %p1447_p7 = pnand %p1445_p6, %p1442_p5 }
 0x1af   :  { %1450 = shalt.err (!%p1447_p7)
}
 0x1b0   :  { %s1458_s18 = smov 128   ;;  %s1459_s19 = smov 8  }
 0x1b1   :  { %1141 = dma.vmem_to_hbm [thread:$0]  %s1136_s9, 1024, %s1730_s5, [#allocation3], %s1458_s18, %s1458_s18, %s1459_s19  }
 0x1b2   :  { %1451 = dma.done.wait [#allocation3], 1024  }
 0x1b3   :  { %1452 = vsyncadd [#allocation3], 4294966272 }
 0x1b4   :  { %1145 = vsyncpa [#allocation3], 1 }

</bundles_post_ra>
